<compile_context>
chip_gen: v7x
topology: tpu7x:2x2x1
jax: 0.10.0
libtpu: 0.0.40
codegen_flags: <defaults>
</compile_context>

<pallas_src>
import functools

import jax
import jax.numpy as jnp
from jax.experimental import pallas as pl
from jax.experimental.pallas import tpu as pltpu


LANES = 128        # lane width (minor dim)
TM_MAX = 8192      # default max rows per block: (8192, 128) f32 = 4 MiB / input buffer
NCORES = 2         # leading "parallel" grid axis (uses both TensorCores on v7x)


def _tversky_partials_kernel(x_ref, t_ref, o_ref, *, tiles_per_core, full_tiles,
                             total_tiles, rows, tm):
    """Accumulates per-core (8,128) vreg partials of sum(x), sum(t), sum(x*t)."""
    c = pl.program_id(0)            # core slice (parallel axis)
    i = pl.program_id(1)            # reduction step within the core slice
    g = c * tiles_per_core + i      # global row-tile index
    groups = tm // 8

    @pl.when(i == 0)
    def _():
        o_ref[...] = jnp.zeros_like(o_ref)

    def accumulate(valid):
        x = x_ref[...].astype(jnp.float32)
        t = t_ref[...].astype(jnp.float32)
        if valid is not None:
            # Mask BEFORE the multiply: out-of-range rows hold unspecified bits.
            x = jnp.where(valid, x, 0.0)
            t = jnp.where(valid, t, 0.0)
        # Fold rows at vreg granularity (pure VPU adds); the cross-sublane /
        # cross-lane collapse happens once in the tiny JAX epilogue.
        xg = x.reshape(groups, 8, LANES)
        tg = t.reshape(groups, 8, LANES)
        o_ref[0, 0, :, :] += jnp.sum(xg, axis=0)
        o_ref[0, 1, :, :] += jnp.sum(tg, axis=0)
        o_ref[0, 2, :, :] += jnp.sum(xg * tg, axis=0)

    def accumulate_masked():
        local = jax.lax.broadcasted_iota(jnp.int32, (tm, 1), 0)
        accumulate((g * tm + local) < rows)

    if full_tiles >= total_tiles:
        # Every grid tile is completely in range: no mask code generated.
        accumulate(None)
    elif full_tiles == 0:
        # Tiny input: the single tile is ragged.
        accumulate_masked()
    else:
        # Mask only the ragged last tile / clamped duplicate tiles (runtime gate).
        @pl.when(g < full_tiles)
        def _():
            accumulate(None)

        @pl.when(g >= full_tiles)
        def _():
            accumulate_masked()


@functools.partial(
    jax.jit, static_argnames=("alpha", "beta", "gamma", "smooth", "block_rows"))
def focal_tversky_loss(inputs, targets, alpha=0.5, beta=0.5, gamma=1.0,
                       smooth=1.0, block_rows=TM_MAX):
    x = jnp.ravel(inputs)
    t = jnp.ravel(targets)
    n = x.shape[0]

    # 128-aligned prefix goes through the kernel; the <=127-element tail (only
    # when n % 128 != 0) is folded in the wrapper — no full-array pad copy.
    n_main = (n // LANES) * LANES
    rows = n_main // LANES

    sum_x = jnp.float32(0.0)
    sum_t = jnp.float32(0.0)
    tp = jnp.float32(0.0)

    if rows > 0:
        if n_main == n:
            x2 = x.reshape(rows, LANES)       # free, row-major
            t2 = t.reshape(rows, LANES)
        else:
            x2 = x[:n_main].reshape(rows, LANES)
            t2 = t[:n_main].reshape(rows, LANES)

        # Row tile: multiple of the sublane tile for both dtypes, as large as
        # possible to amortize per-grid-step pipeline overhead.
        align_for = {4: 8, 2: 16, 1: 32}
        row_align = max(align_for.get(jnp.dtype(x2.dtype).itemsize, 8),
                        align_for.get(jnp.dtype(t2.dtype).itemsize, 8))
        tm = min(int(block_rows), row_align * pl.cdiv(rows, row_align))
        tm = max(row_align, (tm // row_align) * row_align)

        tiles = pl.cdiv(rows, tm)
        ncores = NCORES if tiles >= NCORES else 1
        tiles_per_core = pl.cdiv(tiles, ncores)
        total_tiles = ncores * tiles_per_core
        full_tiles = rows // tm               # tiles with no ragged rows

        def idx_map(c, i):
            # Clamp: when the tile count is odd, core 1's last step would index
            # past the final tile; its contribution is masked to zero in-kernel.
            return (jnp.minimum(c * tiles_per_core + i, tiles - 1), 0)

        kernel = functools.partial(
            _tversky_partials_kernel, tiles_per_core=tiles_per_core,
            full_tiles=full_tiles, total_tiles=total_tiles, rows=rows, tm=tm)

        out_bytes = ncores * 3 * 8 * LANES * 4
        in_bytes = (jnp.dtype(x2.dtype).itemsize
                    + jnp.dtype(t2.dtype).itemsize) * n_main

        partials = pl.pallas_call(
            kernel,
            out_shape=jax.ShapeDtypeStruct((ncores, 3, 8, LANES), jnp.float32),
            grid_spec=pltpu.PrefetchScalarGridSpec(
                num_scalar_prefetch=0,
                grid=(ncores, tiles_per_core),
                in_specs=[
                    pl.BlockSpec((tm, LANES), idx_map),
                    pl.BlockSpec((tm, LANES), idx_map),
                ],
                out_specs=pl.BlockSpec((1, 3, 8, LANES),
                                       lambda c, i: (c, 0, 0, 0)),
            ),
            compiler_params=pltpu.CompilerParams(
                dimension_semantics=("parallel", "arbitrary"),
                # Big row tiles exceed v5e's 16 MiB scoped default; only request
                # a larger limit when the tiles are actually big.
                vmem_limit_bytes=(40 << 20) if tm >= 2048 else None,
            ),
            cost_estimate=pl.CostEstimate(
                flops=4 * n_main,
                transcendentals=0,
                bytes_accessed=in_bytes + out_bytes,
            ),
        )(x2, t2)

        sums = jnp.sum(partials, axis=(0, 2, 3))   # tiny collapse of partials
        sum_x = sums[0]
        sum_t = sums[1]
        tp = sums[2]

    if n_main != n:
        xt = x[n_main:].astype(jnp.float32)
        tt = t[n_main:].astype(jnp.float32)
        sum_x = sum_x + jnp.sum(xt)
        sum_t = sum_t + jnp.sum(tt)
        tp = tp + jnp.sum(xt * tt)

    fp = sum_x - tp                 # == sum((1 - t) * x)
    fn = sum_t - tp                 # == sum(t * (1 - x))
    tversky = (tp + smooth) / (tp + alpha * fp + beta * fn + smooth)
    return (1.0 - tversky) ** gamma


def _reference(inputs, targets, alpha=0.5, beta=0.5, gamma=1.0, smooth=1.0):
    x = jnp.ravel(inputs).astype(jnp.float32)
    t = jnp.ravel(targets).astype(jnp.float32)
    tp = jnp.sum(x * t)
    fp = jnp.sum((1.0 - t) * x)
    fn = jnp.sum(t * (1.0 - x))
    tversky = (tp + smooth) / (tp + alpha * fp + beta * fn + smooth)
    return (1.0 - tversky) ** gamma


if __name__ == "__main__":
    key = jax.random.PRNGKey(0)
    k1, k2 = jax.random.split(key)

    # NCHW-shaped synthetic inputs (probabilities) and binary targets.
    inputs = jax.nn.sigmoid(jax.random.normal(k1, (2, 4, 16, 16), dtype=jnp.float32))
    targets = (jax.random.uniform(k2, (2, 4, 16, 16)) > 0.5).astype(jnp.float32)

    out = focal_tversky_loss(inputs, targets, alpha=0.5, beta=0.5, gamma=1.0, smooth=1.0)
    out = jax.block_until_ready(out)
    ref = _reference(inputs, targets)
    assert jnp.allclose(out, ref, rtol=1e-5, atol=1e-6), (out, ref)

    # Extra coverage: multi-tile + 2-slice parallel axis + ragged / duplicated
    # tail tiles (forced small block_rows).
    k3, k4 = jax.random.split(k2)
    x_b = jax.nn.sigmoid(jax.random.normal(k3, (2, 4, 20, 16), dtype=jnp.float32))
    t_b = (jax.random.uniform(k4, (2, 4, 20, 16)) > 0.5).astype(jnp.float32)
    out_b = jax.block_until_ready(focal_tversky_loss(x_b, t_b, block_rows=8))
    assert jnp.allclose(out_b, _reference(x_b, t_b), rtol=1e-5, atol=1e-6), (out_b,)

    # Extra coverage: flat size not a multiple of 128 (wrapper tail path +
    # ragged single tile).
    k5, k6 = jax.random.split(k4)
    x_c = jax.nn.sigmoid(jax.random.normal(k5, (3, 5, 7, 11), dtype=jnp.float32))
    t_c = (jax.random.uniform(k6, (3, 5, 7, 11)) > 0.5).astype(jnp.float32)
    out_c = jax.block_until_ready(focal_tversky_loss(x_c, t_c))
    assert jnp.allclose(out_c, _reference(x_c, t_c), rtol=1e-5, atol=1e-6), (out_c,)

    print("KERNEL_OK")
</pallas_src>

<mosaic_0001>
module attributes {stable_mosaic.version = 11 : i64} {
  func.func @_tversky_partials_kernel(%arg0: i32, %arg1: i32, %arg2: memref<16x128xf32, #tpu.memory_space<vmem>>, %arg3: memref<16x128xf32, #tpu.memory_space<vmem>>, %arg4: memref<1x3x8x128xf32, #tpu.memory_space<vmem>>) attributes {dimension_semantics = [#tpu.dimension_semantics<parallel>, #tpu.dimension_semantics<arbitrary>], iteration_bounds = array<i64: 1, 1>, scalar_prefetch = 0 : i64, scratch_operands = 0 : i64, tpu.core_type = #tpu.core_type<tc>, window_params = [{transform_indices = @transform_0, window_bounds = array<i64: 16, 128>}, {transform_indices = @transform_1, window_bounds = array<i64: 16, 128>}, {transform_indices = @transform_2, window_bounds = array<i64: 1, 3, 8, 128>}]} {
    %c0_i32 = arith.constant 0 : i32
    %0 = arith.cmpi eq, %arg1, %c0_i32 : i32
    %1 = arith.extui %0 : i1 to i32
    %c0_i32_0 = arith.constant 0 : i32
    %2 = arith.cmpi ne, %1, %c0_i32_0 : i32
    scf.if %2 {
      %cst_28 = arith.constant 0.000000e+00 : f32
      %29 = vector.broadcast %cst_28 : f32 to vector<1x3x8x128xf32>
      %c0_29 = arith.constant 0 : index
      %c0_30 = arith.constant 0 : index
      %c0_31 = arith.constant 0 : index
      %c0_32 = arith.constant 0 : index
      %30 = vector.load %arg4[%c0_29, %c0_30, %c0_31, %c0_32] : memref<1x3x8x128xf32, #tpu.memory_space<vmem>>, vector<1x3x8x128xf32>
      tpu.vector_store %arg4[%c0_29, %c0_30, %c0_31, %c0_32], %29 {strides = array<i32>} : memref<1x3x8x128xf32, #tpu.memory_space<vmem>>, vector<1x3x8x128xf32>,
    } else {
    }
    %c0 = arith.constant 0 : index
    %c0_1 = arith.constant 0 : index
    %3 = vector.load %arg2[%c0, %c0_1] : memref<16x128xf32, #tpu.memory_space<vmem>>, vector<16x128xf32>
    %c0_2 = arith.constant 0 : index
    %c0_3 = arith.constant 0 : index
    %4 = vector.load %arg3[%c0_2, %c0_3] : memref<16x128xf32, #tpu.memory_space<vmem>>, vector<16x128xf32>
    %5 = vector.shape_cast %3 : vector<16x128xf32> to vector<2x8x128xf32>
    %6 = vector.shape_cast %4 : vector<16x128xf32> to vector<2x8x128xf32>
    %c0_4 = arith.constant 0 : index
    %c0_5 = arith.constant 0 : index
    %c0_6 = arith.constant 0 : index
    %c0_7 = arith.constant 0 : index
    %7 = vector.load %arg4[%c0_4, %c0_5, %c0_6, %c0_7] : memref<1x3x8x128xf32, #tpu.memory_space<vmem>>, vector<1x1x8x128xf32>
    %8 = vector.shape_cast %7 : vector<1x1x8x128xf32> to vector<8x128xf32>
    %cst = arith.constant dense<0.000000e+00> : vector<8x128xf32>
    %9 = vector.multi_reduction <add>, %5, %cst [0] : vector<2x8x128xf32> to vector<8x128xf32>
    %10 = arith.addf %8, %9 : vector<8x128xf32>
    %c0_8 = arith.constant 0 : index
    %c0_9 = arith.constant 0 : index
    %c0_10 = arith.constant 0 : index
    %c0_11 = arith.constant 0 : index
    %11 = vector.load %arg4[%c0_8, %c0_9, %c0_10, %c0_11] : memref<1x3x8x128xf32, #tpu.memory_space<vmem>>, vector<1x1x8x128xf32>
    %12 = vector.shape_cast %11 : vector<1x1x8x128xf32> to vector<8x128xf32>
    %13 = vector.shape_cast %10 : vector<8x128xf32> to vector<1x1x8x128xf32>
    tpu.vector_store %arg4[%c0_8, %c0_9, %c0_10, %c0_11], %13 {strides = array<i32>} : memref<1x3x8x128xf32, #tpu.memory_space<vmem>>, vector<1x1x8x128xf32>,
    %c0_12 = arith.constant 0 : index
    %c1 = arith.constant 1 : index
    %c0_13 = arith.constant 0 : index
    %c0_14 = arith.constant 0 : index
    %14 = vector.load %arg4[%c0_12, %c1, %c0_13, %c0_14] : memref<1x3x8x128xf32, #tpu.memory_space<vmem>>, vector<1x1x8x128xf32>
    %15 = vector.shape_cast %14 : vector<1x1x8x128xf32> to vector<8x128xf32>
    %cst_15 = arith.constant dense<0.000000e+00> : vector<8x128xf32>
    %16 = vector.multi_reduction <add>, %6, %cst_15 [0] : vector<2x8x128xf32> to vector<8x128xf32>
    %17 = arith.addf %15, %16 : vector<8x128xf32>
    %c0_16 = arith.constant 0 : index
    %c1_17 = arith.constant 1 : index
    %c0_18 = arith.constant 0 : index
    %c0_19 = arith.constant 0 : index
    %18 = vector.load %arg4[%c0_16, %c1_17, %c0_18, %c0_19] : memref<1x3x8x128xf32, #tpu.memory_space<vmem>>, vector<1x1x8x128xf32>
    %19 = vector.shape_cast %18 : vector<1x1x8x128xf32> to vector<8x128xf32>
    %20 = vector.shape_cast %17 : vector<8x128xf32> to vector<1x1x8x128xf32>
    tpu.vector_store %arg4[%c0_16, %c1_17, %c0_18, %c0_19], %20 {strides = array<i32>} : memref<1x3x8x128xf32, #tpu.memory_space<vmem>>, vector<1x1x8x128xf32>,
    %c0_20 = arith.constant 0 : index
    %c2 = arith.constant 2 : index
    %c0_21 = arith.constant 0 : index
    %c0_22 = arith.constant 0 : index
    %21 = vector.load %arg4[%c0_20, %c2, %c0_21, %c0_22] : memref<1x3x8x128xf32, #tpu.memory_space<vmem>>, vector<1x1x8x128xf32>
    %22 = vector.shape_cast %21 : vector<1x1x8x128xf32> to vector<8x128xf32>
    %23 = arith.mulf %5, %6 : vector<2x8x128xf32>
    %cst_23 = arith.constant dense<0.000000e+00> : vector<8x128xf32>
    %24 = vector.multi_reduction <add>, %23, %cst_23 [0] : vector<2x8x128xf32> to vector<8x128xf32>
    %25 = arith.addf %22, %24 : vector<8x128xf32>
    %c0_24 = arith.constant 0 : index
    %c2_25 = arith.constant 2 : index
    %c0_26 = arith.constant 0 : index
    %c0_27 = arith.constant 0 : index
    %26 = vector.load %arg4[%c0_24, %c2_25, %c0_26, %c0_27] : memref<1x3x8x128xf32, #tpu.memory_space<vmem>>, vector<1x1x8x128xf32>
    %27 = vector.shape_cast %26 : vector<1x1x8x128xf32> to vector<8x128xf32>
    %28 = vector.shape_cast %25 : vector<8x128xf32> to vector<1x1x8x128xf32>
    tpu.vector_store %arg4[%c0_24, %c2_25, %c0_26, %c0_27], %28 {strides = array<i32>} : memref<1x3x8x128xf32, #tpu.memory_space<vmem>>, vector<1x1x8x128xf32>,
    return
  }
  func.func @transform_0(%arg0: i32, %arg1: i32) -> (i32, i32) {
    %c1_i32 = arith.constant 1 : i32
    %0 = arith.muli %arg0, %c1_i32 : i32
    %1 = arith.addi %0, %arg1 : i32
    %c0_i32 = arith.constant 0 : i32
    %2 = arith.minsi %1, %c0_i32 : i32
    %c0_i32_0 = arith.constant 0 : i32
    %c0_i32_1 = arith.constant 0 : i32
    return %2, %c0_i32_0 : i32, i32
  }
  func.func @transform_1(%arg0: i32, %arg1: i32) -> (i32, i32) {
    %c1_i32 = arith.constant 1 : i32
    %0 = arith.muli %arg0, %c1_i32 : i32
    %1 = arith.addi %0, %arg1 : i32
    %c0_i32 = arith.constant 0 : i32
    %2 = arith.minsi %1, %c0_i32 : i32
    %c0_i32_0 = arith.constant 0 : i32
    %c0_i32_1 = arith.constant 0 : i32
    return %2, %c0_i32_0 : i32, i32
  }
  func.func @transform_2(%arg0: i32, %arg1: i32) -> (i32, i32, i32, i32) {
    %c0_i32 = arith.constant 0 : i32
    %c0_i32_0 = arith.constant 0 : i32
    %c0_i32_1 = arith.constant 0 : i32
    %c0_i32_2 = arith.constant 0 : i32
    return %arg0, %c0_i32, %c0_i32_0, %c0_i32_1 : i32, i32, i32, i32
  }
}

</mosaic_0001>

<bundles_post_ra>
// kernel: focal_tversky_loss.1
= control target key start
LH: loop header
LB: loop body
LE: loop exit
PB: predicated region body
PF: predicated region fallthrough
CT: control target
= control target key end

     0   :  { %s159_s0 = inlined_call_operand.vmem [shape: f32[16,128], index: 0, kind: input, shape index: {}]   ;;  %s160_s1 = inlined_call_operand.vmem [shape: f32[16,128], index: 1, kind: input, shape index: {}]   ;;  %s161_s2 = inlined_call_operand.vmem [shape: f32[1,3,8,128], index: 2, kind: output, shape index: {}]  }
   0x1   :  { %v82_v0 = vld [vmem:[%s159_s0] sm:$0xff]  ;;  %v83_v1 = vld [vmem:[%s159_s0 + $0x8] sm:$0xff] }
   0x2   :  { %v84_v2 = vld [vmem:[%s160_s1] sm:$0xff]  ;;  %v87_v3 = vadd.f32 %v83_v1, %v82_v0  ;;  %v85_v4 = vld [vmem:[%s160_s1 + $0x8] sm:$0xff] }
   0x3   :  { %v97_v5 = vmul.f32 %v84_v2, %v82_v0  ;;  %v92_v6 = vadd.f32 %v85_v4, %v84_v2  ;;  %v98_v7 = vmul.f32 %v85_v4, %v83_v1 }
   0x4   :  { %89 = vst [vmem:[%s161_s2] sm:$0xff] %v87_v3 }
   0x5   :  { %v99_v8 = vadd.f32 %v98_v7, %v97_v5  ;;  %119 = vst [vmem:[%s161_s2 + $0x8] sm:$0xff] %v92_v6 }
   0x7   :  { %121 = vst [vmem:[%s161_s2 + $0x10] sm:$0xff] %v99_v8 }

</bundles_post_ra>
